<compile_context>
chip_gen: v7x
topology: tpu7x:2x2x1
jax: 0.10.0
libtpu: 0.0.40
codegen_flags: <defaults>
</compile_context>

<pallas_src>
import jax
import jax.numpy as jnp
from jax.experimental import pallas as pl
from jax.experimental.pallas import tpu as pltpu


def _curv_agg_kernel(data_ref, curv_ref, w_ref, r_ref, o_ref):
    f32 = jnp.float32
    D = w_ref.shape[0]                     # d_model = dim + 1
    dim = data_ref.shape[-1]

    data = data_ref[...]                   # (N, dim)
    curv = curv_ref[...]                   # (N, 1)
    rows = r_ref[...]                      # (8, D) packed row vectors

    b1    = rows[0:1, :]                   # embedding1 bias
    bfc   = rows[1:2, :]                   # fc bias
    gamma = rows[2:3, :]                   # LayerNorm weight
    beta  = rows[3:4, :]                   # LayerNorm bias
    w1_c  = rows[4:5, :]                   # last row of W1 (curvature column of concat)
    w2t   = rows[5:6, :]                   # embedding2 weight, transposed to a row
    b2    = rows[6:7, 0:1]                 # embedding2 bias (scalar)

    # embedding1 with the concat folded in as a rank-1 update:
    #   [data | curv] @ W1 = data @ W1[:dim] + curv * W1[dim]
    t = (jax.lax.dot_general(data, w_ref[0:dim, 3 * D:4 * D],
                             (((1,), (0,)), ((), ())),
                             preferred_element_type=f32)
         + curv * w1_c + b1)                                           # (N, D)

    # Fused Q/K/V projection (1/sqrt(D) pre-folded into Wq).
    qkv = jnp.dot(t, w_ref[:, 0:3 * D], preferred_element_type=f32)    # (N, 3D)
    q = qkv[:, 0:D]
    k = qkv[:, D:2 * D]
    v = qkv[:, 2 * D:3 * D]

    # Scores without materializing k.T (contract last dims of both operands).
    s = jax.lax.dot_general(q, k, (((1,), (1,)), ((), ())),
                            preferred_element_type=f32)                # (N, N)
    s = s - jnp.max(s, axis=-1, keepdims=True)
    p = jnp.exp(s)
    p = p * pl.reciprocal(jnp.sum(p, axis=-1, keepdims=True), approx=True)
    # TODO(synk): attention/output dropout (p=0.5) omitted -> eval-mode semantics.
    att = jnp.dot(p, v, preferred_element_type=f32)                    # (N, D)

    # fc + residual + LayerNorm(d_model)
    out = jnp.dot(att, w_ref[:, 4 * D:5 * D], preferred_element_type=f32) + bfc + t
    mu = jnp.mean(out, axis=-1, keepdims=True)
    ctr = out - mu
    var = jnp.mean(ctr * ctr, axis=-1, keepdims=True)
    out = ctr * jax.lax.rsqrt(var + 1e-5)
    out = out * gamma + beta

    # embedding2 -> lane-dense (1, N) row: y_row = w2^T @ out^T  (+ b2)
    y = jax.lax.dot_general(w2t, out, (((1,), (1,)), ((), ())),
                            preferred_element_type=f32) + b2           # (1, N)
    o_ref[...] = y


def pack_params(params):
    """One-time packing: fold scale into Wq, split W1 for the in-kernel concat,
    and pack everything into one (D, 5D) matrix slab + one (8, D) row slab."""
    D = params["w1"].shape[0]
    dim = D - 1
    scale = 1.0 / jnp.sqrt(jnp.float32(D))
    # column layout: [ Wq*scale | Wk | Wv | W1 | Wfc ]  -> qkv slice starts at lane 0
    w_slab = jnp.concatenate(
        [params["wq"] * scale, params["wk"], params["wv"],
         params["w1"], params["wfc"]], axis=1).astype(jnp.float32)      # (D, 5D)

    rows = jnp.zeros((8, D), jnp.float32)
    rows = rows.at[0].set(params["b1"].reshape(D))
    rows = rows.at[1].set(params["bfc"].reshape(D))
    rows = rows.at[2].set(params["gamma"].reshape(D))
    rows = rows.at[3].set(params["beta"].reshape(D))
    rows = rows.at[4].set(params["w1"][dim])          # curvature row of W1
    rows = rows.at[5].set(params["w2"].reshape(D))    # w2^T
    rows = rows.at[6, 0].set(params["b2"].reshape(()))
    return {"w_slab": w_slab, "rows": rows}


def curvature_aggregator_batched(curvature, data, packed):
    """curvature: (B, N), data: (B, N, dim) -> ((B, N), zeros(B, N, dim))."""
    B, N = curvature.shape
    dim = data.shape[-1]
    D = dim + 1

    data3 = data.astype(jnp.float32)
    curv3 = curvature.reshape(B, N, 1).astype(jnp.float32)
    w_slab = packed["w_slab"]
    rows = packed["rows"]

    y = pl.pallas_call(
        _curv_agg_kernel,
        out_shape=jax.ShapeDtypeStruct((B, 1, N), jnp.float32),
        grid=(B,),
        in_specs=[
            pl.BlockSpec((None, N, dim), lambda b: (b, 0, 0)),   # per-episode data
            pl.BlockSpec((None, N, 1), lambda b: (b, 0, 0)),     # per-episode curvature
            pl.BlockSpec((D, 5 * D), lambda b: (0, 0)),          # weight slab (resident)
            pl.BlockSpec((8, D), lambda b: (0, 0)),              # row slab (resident)
        ],
        out_specs=pl.BlockSpec((None, 1, N), lambda b: (b, 0, 0)),
        compiler_params=pltpu.CompilerParams(
            dimension_semantics=("parallel",)),
    )(data3, curv3, w_slab, rows)

    return y.reshape(B, N), jnp.zeros((B, N, dim), jnp.float32)


def curvature_aggregator(curvature, data, packed):
    """Module-equivalent single-episode API: curvature (N,), data (N, dim)."""
    N = curvature.shape[0]
    dim = data.shape[-1]
    y, _ = curvature_aggregator_batched(curvature[None], data[None], packed)
    return y.reshape(N), jnp.zeros((N, dim), jnp.float32)


def init_params(key, dim):
    """Deterministic synthetic parameters matching the module's shapes.
    All matrices stored transposed (in_features, out_features) so forward is x @ W + b."""
    D = dim + 1
    ks = jax.random.split(key, 8)
    s = 0.1
    return {
        "w1":   (s * jax.random.normal(ks[0], (D, D))).astype(jnp.float32),
        "b1":   (s * jax.random.normal(ks[1], (1, D))).astype(jnp.float32),
        "wq":   (s * jax.random.normal(ks[2], (D, D))).astype(jnp.float32),
        "wk":   (s * jax.random.normal(ks[3], (D, D))).astype(jnp.float32),
        "wv":   (s * jax.random.normal(ks[4], (D, D))).astype(jnp.float32),
        "wfc":  (s * jax.random.normal(ks[5], (D, D))).astype(jnp.float32),
        "bfc":  jnp.zeros((1, D), jnp.float32),
        "gamma": jnp.ones((1, D), jnp.float32),
        "beta":  jnp.zeros((1, D), jnp.float32),
        "w2":   (s * jax.random.normal(ks[6], (D, 1))).astype(jnp.float32),
        "b2":   (s * jax.random.normal(ks[7], (1, 1))).astype(jnp.float32),
    }


def reference_forward(curvature, data, params):
    """Pure-JAX reference of the same forward (for correctness check)."""
    N = curvature.shape[0]
    x = jnp.concatenate([data, curvature.reshape(N, 1)], axis=1)
    t = x @ params["w1"] + params["b1"]
    q, k, v = t @ params["wq"], t @ params["wk"], t @ params["wv"]
    D = q.shape[-1]
    s = (q @ k.T) / jnp.sqrt(jnp.float32(D))
    p = jax.nn.softmax(s, axis=-1)
    att = p @ v
    out = att @ params["wfc"] + params["bfc"] + t
    mu = out.mean(-1, keepdims=True)
    var = ((out - mu) ** 2).mean(-1, keepdims=True)
    out = (out - mu) / jnp.sqrt(var + 1e-5) * params["gamma"] + params["beta"]
    return (out @ params["w2"] + params["b2"]).reshape(N)


if __name__ == "__main__":
    # Module-consistent small shapes: dim=31 (-> D=32 lane-friendly), class_num N=8,
    # plus a batch of B=4 episodes to exercise the parallel grid axis.
    dim, N, B = 31, 8, 4

    key = jax.random.PRNGKey(0)
    k_c, k_d, k_p, k_cb, k_db = jax.random.split(key, 5)
    curvature = jax.random.normal(k_c, (N,), jnp.float32)
    data = jax.random.normal(k_d, (N, dim), jnp.float32)
    params = init_params(k_p, dim)
    packed = pack_params(params)

    # Single-episode call (matches the PyTorch module's forward).
    y, zeros_out = curvature_aggregator(curvature, data, packed)
    y = jax.block_until_ready(y)
    zeros_out = jax.block_until_ready(zeros_out)
    y_ref = reference_forward(curvature, data, params)
    assert y.shape == (N,)
    assert zeros_out.shape == (N, dim)
    # tolerance loosened slightly because the softmax denominator uses the EUP
    # approximate reciprocal (pl.reciprocal(approx=True)).
    assert jnp.allclose(y, y_ref, atol=2e-3, rtol=2e-3)

    # Batched call (grid over episodes, 'parallel' -> both TCs on v7x).
    curv_b = jax.random.normal(k_cb, (B, N), jnp.float32)
    data_b = jax.random.normal(k_db, (B, N, dim), jnp.float32)
    y_b, zeros_b = curvature_aggregator_batched(curv_b, data_b, packed)
    y_b = jax.block_until_ready(y_b)
    y_ref_b = jax.vmap(lambda c, d: reference_forward(c, d, params))(curv_b, data_b)
    assert y_b.shape == (B, N)
    assert zeros_b.shape == (B, N, dim)
    assert jnp.allclose(y_b, y_ref_b, atol=2e-3, rtol=2e-3)

    print("KERNEL_OK")
</pallas_src>

<mosaic_0001>
module attributes {stable_mosaic.version = 11 : i64} {
  func.func @_curv_agg_kernel(%arg0: i32, %arg1: memref<1x8x31xf32, #tpu.memory_space<vmem>>, %arg2: memref<1x8x1xf32, #tpu.memory_space<vmem>>, %arg3: memref<32x160xf32, #tpu.memory_space<vmem>>, %arg4: memref<8x32xf32, #tpu.memory_space<vmem>>, %arg5: memref<1x1x8xf32, #tpu.memory_space<vmem>>) attributes {dimension_semantics = [#tpu.dimension_semantics<parallel>], iteration_bounds = array<i64: 1>, scalar_prefetch = 0 : i64, scratch_operands = 0 : i64, tpu.core_type = #tpu.core_type<tc>, window_params = [{transform_indices = @transform_0, window_bounds = array<i64: 1, 8, 31>}, {transform_indices = @transform_1, window_bounds = array<i64: 1, 8, 1>}, {pipeline_mode = #tpu.pipeline_mode<synchronous>, transform_indices = @transform_2, window_bounds = array<i64: 32, 160>}, {pipeline_mode = #tpu.pipeline_mode<synchronous>, transform_indices = @transform_3, window_bounds = array<i64: 8, 32>}, {transform_indices = @transform_4, window_bounds = array<i64: 1, 1, 8>}]} {
    %c0 = arith.constant 0 : index
    %c0_0 = arith.constant 0 : index
    %c0_1 = arith.constant 0 : index
    %0 = vector.load %arg1[%c0, %c0_0, %c0_1] : memref<1x8x31xf32, #tpu.memory_space<vmem>>, vector<1x8x31xf32>
    %1 = vector.shape_cast %0 : vector<1x8x31xf32> to vector<8x31xf32>
    %c0_2 = arith.constant 0 : index
    %c0_3 = arith.constant 0 : index
    %c0_4 = arith.constant 0 : index
    %2 = vector.load %arg2[%c0_2, %c0_3, %c0_4] : memref<1x8x1xf32, #tpu.memory_space<vmem>>, vector<1x8x1xf32>
    %3 = vector.shape_cast %2 : vector<1x8x1xf32> to vector<8x1xf32>
    %c0_5 = arith.constant 0 : index
    %c0_6 = arith.constant 0 : index
    %4 = vector.load %arg4[%c0_5, %c0_6] : memref<8x32xf32, #tpu.memory_space<vmem>>, vector<8x32xf32>
    %5 = vector.extract_strided_slice %4 {offsets = [0, 0], sizes = [1, 32], strides = [1, 1]} : vector<8x32xf32> to vector<1x32xf32>
    %6 = vector.extract_strided_slice %4 {offsets = [1, 0], sizes = [1, 32], strides = [1, 1]} : vector<8x32xf32> to vector<1x32xf32>
    %7 = vector.extract_strided_slice %4 {offsets = [2, 0], sizes = [1, 32], strides = [1, 1]} : vector<8x32xf32> to vector<1x32xf32>
    %8 = vector.extract_strided_slice %4 {offsets = [3, 0], sizes = [1, 32], strides = [1, 1]} : vector<8x32xf32> to vector<1x32xf32>
    %9 = vector.extract_strided_slice %4 {offsets = [4, 0], sizes = [1, 32], strides = [1, 1]} : vector<8x32xf32> to vector<1x32xf32>
    %10 = vector.extract_strided_slice %4 {offsets = [5, 0], sizes = [1, 32], strides = [1, 1]} : vector<8x32xf32> to vector<1x32xf32>
    %11 = vector.extract_strided_slice %4 {offsets = [6, 0], sizes = [1, 1], strides = [1, 1]} : vector<8x32xf32> to vector<1x1xf32>
    %c0_7 = arith.constant 0 : index
    %c96 = arith.constant 96 : index
    %12 = vector.load %arg3[%c0_7, %c96] : memref<32x160xf32, #tpu.memory_space<vmem>>, vector<31x32xf32>
    %cst = arith.constant dense<0.000000e+00> : vector<8x32xf32>
    %13 = tpu.matmul %1, %12, %cst {dimension_numbers = #tpu.dot_dimension_numbers<[1], [0], [0], [1], [0, 0, 1, 1], [], []>} : vector<8x31xf32>, vector<31x32xf32>, vector<8x32xf32> -> vector<8x32xf32>
    %14 = vector.broadcast %3 : vector<8x1xf32> to vector<8x32xf32>
    %15 = vector.broadcast %9 : vector<1x32xf32> to vector<8x32xf32>
    %16 = arith.mulf %14, %15 : vector<8x32xf32>
    %17 = arith.addf %13, %16 : vector<8x32xf32>
    %18 = vector.broadcast %5 : vector<1x32xf32> to vector<8x32xf32>
    %19 = arith.addf %17, %18 : vector<8x32xf32>
    %c0_8 = arith.constant 0 : index
    %c0_9 = arith.constant 0 : index
    %20 = vector.load %arg3[%c0_8, %c0_9] : memref<32x160xf32, #tpu.memory_space<vmem>>, vector<32x96xf32>
    %cst_10 = arith.constant dense<0.000000e+00> : vector<8x96xf32>
    %21 = tpu.matmul %19, %20, %cst_10 {dimension_numbers = #tpu.dot_dimension_numbers<[1], [0], [0], [1], [0, 0, 1, 1], [], []>} : vector<8x32xf32>, vector<32x96xf32>, vector<8x96xf32> -> vector<8x96xf32>
    %22 = vector.extract_strided_slice %21 {offsets = [0, 0], sizes = [8, 32], strides = [1, 1]} : vector<8x96xf32> to vector<8x32xf32>
    %23 = vector.extract_strided_slice %21 {offsets = [0, 32], sizes = [8, 32], strides = [1, 1]} : vector<8x96xf32> to vector<8x32xf32>
    %24 = vector.extract_strided_slice %21 {offsets = [0, 64], sizes = [8, 32], strides = [1, 1]} : vector<8x96xf32> to vector<8x32xf32>
    %cst_11 = arith.constant dense<0.000000e+00> : vector<8x8xf32>
    %25 = tpu.matmul %22, %23, %cst_11 {dimension_numbers = #tpu.dot_dimension_numbers<[1], [1], [0], [0], [0, 0, 1, 0], [], []>} : vector<8x32xf32>, vector<8x32xf32>, vector<8x8xf32> -> vector<8x8xf32>
    %cst_12 = arith.constant dense<0xFF800000> : vector<8xf32>
    %26 = vector.multi_reduction <maximumf>, %25, %cst_12 [1] : vector<8x8xf32> to vector<8xf32>
    %27 = vector.shape_cast %26 : vector<8xf32> to vector<8x1xf32>
    %28 = vector.broadcast %27 : vector<8x1xf32> to vector<8x8xf32>
    %29 = arith.subf %25, %28 : vector<8x8xf32>
    %30 = math.exp %29 : vector<8x8xf32>
    %cst_13 = arith.constant dense<0.000000e+00> : vector<8xf32>
    %31 = vector.multi_reduction <add>, %30, %cst_13 [1] : vector<8x8xf32> to vector<8xf32>
    %32 = vector.shape_cast %31 : vector<8xf32> to vector<8x1xf32>
    %33 = tpu.reciprocal %32 {approx = true} : vector<8x1xf32> -> vector<8x1xf32>
    %34 = vector.broadcast %33 : vector<8x1xf32> to vector<8x8xf32>
    %35 = arith.mulf %30, %34 : vector<8x8xf32>
    %cst_14 = arith.constant dense<0.000000e+00> : vector<8x32xf32>
    %36 = tpu.matmul %35, %24, %cst_14 {dimension_numbers = #tpu.dot_dimension_numbers<[1], [0], [0], [1], [0, 0, 1, 1], [], []>} : vector<8x8xf32>, vector<8x32xf32>, vector<8x32xf32> -> vector<8x32xf32>
    %c0_15 = arith.constant 0 : index
    %c128 = arith.constant 128 : index
    %37 = vector.load %arg3[%c0_15, %c128] : memref<32x160xf32, #tpu.memory_space<vmem>>, vector<32x32xf32>
    %cst_16 = arith.constant dense<0.000000e+00> : vector<8x32xf32>
    %38 = tpu.matmul %36, %37, %cst_16 {dimension_numbers = #tpu.dot_dimension_numbers<[1], [0], [0], [1], [0, 0, 1, 1], [], []>} : vector<8x32xf32>, vector<32x32xf32>, vector<8x32xf32> -> vector<8x32xf32>
    %39 = vector.broadcast %6 : vector<1x32xf32> to vector<8x32xf32>
    %40 = arith.addf %38, %39 : vector<8x32xf32>
    %41 = arith.addf %40, %19 : vector<8x32xf32>
    %cst_17 = arith.constant dense<0.000000e+00> : vector<8xf32>
    %42 = vector.multi_reduction <add>, %41, %cst_17 [1] : vector<8x32xf32> to vector<8xf32>
    %43 = vector.shape_cast %42 : vector<8xf32> to vector<8x1xf32>
    %cst_18 = arith.constant 3.200000e+01 : f32
    %44 = vector.broadcast %cst_18 : f32 to vector<8x1xf32>
    %45 = arith.divf %43, %44 : vector<8x1xf32>
    %46 = vector.broadcast %45 : vector<8x1xf32> to vector<8x32xf32>
    %47 = arith.subf %41, %46 : vector<8x32xf32>
    %48 = arith.mulf %47, %47 : vector<8x32xf32>
    %cst_19 = arith.constant dense<0.000000e+00> : vector<8xf32>
    %49 = vector.multi_reduction <add>, %48, %cst_19 [1] : vector<8x32xf32> to vector<8xf32>
    %50 = vector.shape_cast %49 : vector<8xf32> to vector<8x1xf32>
    %cst_20 = arith.constant 3.200000e+01 : f32
    %51 = vector.broadcast %cst_20 : f32 to vector<8x1xf32>
    %52 = arith.divf %50, %51 : vector<8x1xf32>
    %cst_21 = arith.constant 9.99999974E-6 : f32
    %53 = vector.broadcast %cst_21 : f32 to vector<8x1xf32>
    %54 = arith.addf %52, %53 : vector<8x1xf32>
    %55 = math.rsqrt %54 : vector<8x1xf32>
    %56 = vector.broadcast %55 : vector<8x1xf32> to vector<8x32xf32>
    %57 = arith.mulf %47, %56 : vector<8x32xf32>
    %58 = vector.broadcast %7 : vector<1x32xf32> to vector<8x32xf32>
    %59 = arith.mulf %57, %58 : vector<8x32xf32>
    %60 = vector.broadcast %8 : vector<1x32xf32> to vector<8x32xf32>
    %61 = arith.addf %59, %60 : vector<8x32xf32>
    %cst_22 = arith.constant dense<0.000000e+00> : vector<1x8xf32>
    %62 = tpu.matmul %10, %61, %cst_22 {dimension_numbers = #tpu.dot_dimension_numbers<[1], [1], [0], [0], [0, 0, 1, 0], [], []>} : vector<1x32xf32>, vector<8x32xf32>, vector<1x8xf32> -> vector<1x8xf32>
    %63 = vector.broadcast %11 : vector<1x1xf32> to vector<1x8xf32>
    %64 = arith.addf %62, %63 : vector<1x8xf32>
    %c0_23 = arith.constant 0 : index
    %c0_24 = arith.constant 0 : index
    %c0_25 = arith.constant 0 : index
    %65 = vector.load %arg5[%c0_23, %c0_24, %c0_25] : memref<1x1x8xf32, #tpu.memory_space<vmem>>, vector<1x1x8xf32>
    %66 = vector.shape_cast %65 : vector<1x1x8xf32> to vector<1x8xf32>
    %67 = vector.shape_cast %64 : vector<1x8xf32> to vector<1x1x8xf32>
    tpu.vector_store %arg5[%c0_23, %c0_24, %c0_25], %67 {strides = array<i32>} : memref<1x1x8xf32, #tpu.memory_space<vmem>>, vector<1x1x8xf32>,
    return
  }
  func.func @transform_0(%arg0: i32) -> (i32, i32, i32) {
    %c0_i32 = arith.constant 0 : i32
    %c0_i32_0 = arith.constant 0 : i32
    %c0_i32_1 = arith.constant 0 : i32
    return %arg0, %c0_i32, %c0_i32_0 : i32, i32, i32
  }
  func.func @transform_1(%arg0: i32) -> (i32, i32, i32) {
    %c0_i32 = arith.constant 0 : i32
    %c0_i32_0 = arith.constant 0 : i32
    %c0_i32_1 = arith.constant 0 : i32
    return %arg0, %c0_i32, %c0_i32_0 : i32, i32, i32
  }
  func.func @transform_2(%arg0: i32) -> (i32, i32) {
    %c0_i32 = arith.constant 0 : i32
    %c0_i32_0 = arith.constant 0 : i32
    %c0_i32_1 = arith.constant 0 : i32
    return %c0_i32, %c0_i32_0 : i32, i32
  }
  func.func @transform_3(%arg0: i32) -> (i32, i32) {
    %c0_i32 = arith.constant 0 : i32
    %c0_i32_0 = arith.constant 0 : i32
    %c0_i32_1 = arith.constant 0 : i32
    return %c0_i32, %c0_i32_0 : i32, i32
  }
  func.func @transform_4(%arg0: i32) -> (i32, i32, i32) {
    %c0_i32 = arith.constant 0 : i32
    %c0_i32_0 = arith.constant 0 : i32
    %c0_i32_1 = arith.constant 0 : i32
    return %arg0, %c0_i32, %c0_i32_0 : i32, i32, i32
  }
}

</mosaic_0001>

<bundles_post_ra>
// kernel: tpu_custom_call.1
= control target key start
LH: loop header
LB: loop body
LE: loop exit
PB: predicated region body
PF: predicated region fallthrough
CT: control target
= control target key end

     0   :  { %9 = vsyncpa [#allocation3], 0  ;;  %s884_s0 = inlined_call_operand.vmem [shape: f32[1,8,31], index: 0, kind: input, shape index: {}]   ;;  %s885_s1 = inlined_call_operand.vmem [shape: f32[1,8,1], index: 1, kind: input, shape index: {}]   ;;  %s886_s2 = inlined_call_operand.hbm [shape: f32[32,160], index: 2, kind: input, shape index: {}]   ;;  %s887_s3 = inlined_call_operand.vmem [shape: f32[8,32], index: 3, kind: input, shape index: {}]   ;;  %s888_s4 = inlined_call_operand.hbm [shape: f32[1,1,8], index: 4, kind: output, shape index: {}]  }
   0x1   :  { %10 = vsyncpa [#allocation4], 0  ;;  %s766_s15 = smov [#allocation2]   ;;  %s718_s19 = scalar_lea.hbm %s886_s2, 1024 }
   0x2   :  { %s20_s16 = sshll.u32 %s766_s15, 4  ;;  %p719_p0 = scmp.ne.s32.totalorder %s886_s2, %s718_s19  ;;  %s21_s16 = int_to_ptr.vmem [resolvable:$true] %s20_s16 }
   0x3   :  { %p722_p1 = scmp.lt.u32.totalorder %s718_s19, %s886_s2 }
   0x5   :  { %p724_p2 = pnand %p722_p1, %p719_p0 }
   0x7   :  { %727 = shalt.err (!%p724_p2)
}
   0x8   :  { %s728_s24 = scalar_lea.vmem %s21_s16, 1024  ;;  %p733_p4 = scmp.lt.s32.totalorder %s21_s16, %s21_s16 }
   0x9   :  { %p729_p3 = scmp.ne.s32.totalorder %s21_s16, %s728_s24  ;;  %p734_p5 = scmp.lt.s32.totalorder %s728_s24, %s728_s24 }
   0xb   :  { %p735_p6 = por %p734_p5, %p733_p4 }
   0xd   :  { %p736_p7 = pnand %p735_p6, %p729_p3 }
   0xf   :  { %739 = shalt.err (!%p736_p7)
}
  0x10   :  { %s767_s25 = smov 256   ;;  %s768_s26 = smov 16  }
  0x11   :  { %26 = dma.hbm_to_vmem [thread:$0]  %s886_s2, 1024, %s21_s16, [#allocation3], %s767_s25, %s767_s25, %s768_s26  }
  0x12   :  { %762 = dma.done.wait [#allocation3], 1024  }
  0x13   :  { %763 = vsyncadd [#allocation3], 4294966272  ;;  %v769_v0 = vmov 0.0|0.0   ;;  %vm770_vm0 = vmmov 0   ;;  %v771_v1 = vmov 0.0   ;;  %v35_v2 = vld [vmem:[#allocation2] sm:$0xff]  ;;  %v44_v22 = vlaneseq }
  0x14   :  { %669 = vmatprep.subr.bf16.mxu0 %v769_v0  ;;  %676 = vmatprep.subr.bf16.mxu1 %v769_v0  ;;  %v36_v3 = vld [vmem:[#allocation2 + $0x10] sm:$0xff]  ;;  %v37_v4 = vld [vmem:[#allocation2 + $0x20] sm:$0xff]  ;;  %v772_v9 = vmov 0   ;;  %s773_s30 = smov 32   ;;  %vm68_vm1 = vcmask 1046528   ;;  %vm774_vm2 = vmmov 1  }
  0x15   :  { %629 = vmatprep.mubr.msk.f32.mxu0 %vm770_vm0, %v771_v1  ;;  %640 = vmatprep.mubr.msk.f32.mxu1 %vm770_vm0, %v771_v1  ;;  %v700_v5 = vpack.i.bf16 %v36_v3, %v35_v2  ;;  %v38_v6 = vld [vmem:[#allocation2 + $0x30] sm:$0x7f]  ;;  %v33_v7 = vld [vmem:[%s885_s1] sm:$0xff]  ;;  %v677_v8 = vpack.c.bf16 %v36_v3, %v35_v2  ;;  %vm674_vm3 = vmpackc.low %vm68_vm1, %vm774_vm2  ;;  %vm64_vm4 = vcmask 252928   ;;  %v833_v23 = vshrl.u32 %v44_v22, 7  ;;  %s777_s8 = smov [#allocation5]  }
  0x16   :  { %710 = vset.pattern.permute.xlu1 %v772_v9  ;;  %711 = vset.pattern.permute.xlu0 %v772_v9  ;;  %v705_v10 = vpack.i.bf16 %v38_v6, %v37_v4  ;;  %v32_v19 = vld [vmem:[%s884_s0] sm:$0xff]  ;;  %v146_v20 = vld [vmem:[#allocation2 + $0x30] sm:$0xff]  ;;  %vm147_vm5 = vcmask 261120   ;;  %s775_s0 = smov 96   ;;  %vm298_vm6 = vcmask 64512   ;;  %v386_v47 = vld [vmem:[#allocation2 + $0x8] sm:$0xff] }
  0x17   :  { %701 = vrot.lane.b32.xlu0 %v700_v5, %s773_s30  ;;  %41 = vperm.xlu1 %710, %v33_v7   ;;  %v680_v21 = vpack.c.bf16 %v146_v20, %v37_v4  ;;  %v46_v24 = vsub.s32 4, %v833_v23  ;;  %v839_v25 = vld [vmem:[%s887_s3] sm:$0xff]  ;;  %v143_v28 = vsub.s32 0, %v833_v23  ;;  %s776_s3 = smov 64   ;;  %v387_v48 = vld [vmem:[#allocation2 + $0x18] sm:$0xff]  ;;  %v388_v49 = vld [vmem:[#allocation2 + $0x28] sm:$0xff] }
  0x18   :  { %678 = vmatpush3.bf16.msra.mxu1 %v677_v8  ;;  %v683_v50 = vpack.c.bf16 %v387_v48, %v386_v47  ;;  %v389_v51 = vld [vmem:[#allocation2 + $0x38] sm:$0xff]  ;;  %v392_v58 = vsub.s32 1, %v833_v23  ;;  %v484_v9 = vsub.s32 2, %v833_v23  ;;  %s582_s9 = sshll.u32 %s777_s8, 4  ;;  %vm574_vm7 = vcmask 57344   ;;  %s583_s9 = int_to_ptr.vmem [resolvable:$true] %s582_s9 }
  0x19   :  { %679 = vmatprep.subr.bf16.mxu1 %v769_v0  ;;  %v47_v26 = vrot.slane %v839_v25, %v46_v24  ;;  %v144_v30 = vrot.slane %v839_v25, %v143_v28  ;;  %v686_v52 = vpack.c.bf16 %v389_v51, %v388_v49  ;;  %s740_s10 = scalar_lea.vmem %s583_s9, 16  ;;  %s744_s11 = scalar_lea.vmem %s583_s9, 32 }
  0x1a   :  { %v393_v59 = vrot.slane %v839_v25, %v392_v58  ;;  %p741_p8 = scmp.ne.s32.totalorder %s583_s9, %s740_s10  ;;  %p745_p9 = scmp.lt.s32.totalorder %s583_s9, %s583_s9 }
  0x1b   :  { %706 = vrot.lane.b32.xlu0 %v705_v10, %s773_s30  ;;  %v489_v10 = vsub.s32 3, %v833_v23  ;;  %p746_p10 = scmp.lt.s32.totalorder %s744_s11, %s740_s10 }
  0x1c   :  { %681 = vmatpush3.bf16.msra.mxu1 %v680_v21 }
  0x1d   :  { %648 = vmatprep.subr.mxu1 %v771_v1  ;;  %p747_p11 = por %p746_p10, %p745_p9 }
  0x1f   :  { %p748_p12 = pnand %p747_p11, %p741_p8 }
  0x89   :  { %v702_v11 = vpop.permute.xlu0 %701 }
  0x8a   :  { %v704_v12 = vunpack.i.h.bf16 %v702_v11  ;;  %v703_v13 = vunpack.i.l.bf16 %v702_v11  ;;  %v485_v11 = vrot.slane %v839_v25, %v484_v9 }
  0x8c   :  { %v670_v14 = vpack.c.bf16 %v704_v12, %v703_v13 }
  0x8d   :  { %v707_v15 = vpop.permute.xlu0 %706 }
  0x8e   :  { %v709_v16 = vunpack.i.h.bf16 %v707_v15  ;;  %v708_v17 = vunpack.i.l.bf16 %v707_v15  ;;  %671 = vmatpush3.bf16.msra.mxu0 %v670_v14  ;;  %v490_v14 = vrot.slane %v839_v25, %v489_v10 }
  0x8f   :  { %672 = vmatprep.subr.bf16.mxu0 %v769_v0 }
  0x90   :  { %v673_v18 = vpack.c.bf16 %v709_v16, %v708_v17  ;;  %v496_v17 = vrot.slane %v839_v25, 5 }
  0x92   :  { %675 = vmatpush3.bf16.msk.msra.mxu0 %vm674_vm3, %v673_v18 }
  0x93   :  { %643 = vmatprep.subr.mxu0 %v771_v1 }
  0x95   :  { %630 = vmatmul.mubr.msk.f32.vlgmr.msra.gmra.mrb[0].mxu0 %vm64_vm4, %v32_v19 }
  0x96   :  { %645 = vmatprep.mubr.msk.f32.mxu0 %vm770_vm0, %v771_v1  ;;  %v42_v27 = vpop.permute.xlu1 %41 }
  0x97   :  { %v48_v29 = vmul.f32 %v47_v26, %v42_v27 }
 0x168   :  { %v137_v31 = vpop.f32.mrb[0].mxu0 }
 0x169   :  { %v138_v32 = vadd.f32 %v137_v31, %v48_v29  ;;  %v631_v33 = vpop.f32.mrb[1].mxu0 }
 0x16b   :  { %v145_v34 = vadd.f32 %v144_v30, %v138_v32 }
 0x16d   :  { %641 = vmatmul.mubr.msk.f32.vlgmr.msra.gmra.mrb[0].mxu1 %vm147_vm5, %v145_v34 }
 0x16e   :  { %650 = vmatprep.mubr.msk.f32.mxu1 %vm770_vm0, %v771_v1 }
 0x240   :  { %v217_v35 = vpop.f32.mrb[0].mxu1 }
 0x241   :  { %222 = vrot.lane.b32.xlu1 %v217_v35, %s775_s0  ;;  %v642_v36 = vpop.f32.mrb[1].mxu1 }
 0x2b3   :  { %v223_v37 = vpop.permute.xlu1 %222 }
 0x2b4   :  { %644 = vmatpush3.xpose.msk.msra.mxu0 %vm147_vm5, %v223_v37 }
 0x2b5   :  { %682 = vmatprep.subr.bf16.mxu0 %v769_v0 }
 0x2b7   :  { %646 = vmatmul.mubr.msk.f32.vlgmr.msra.gmra.mrb[2].mxu0 %vm147_vm5, %v217_v35 }
 0x2b8   :  { %661 = vmatprep.mubr.msk.f32.mxu0 %vm770_vm0, %v771_v1  ;;  %684 = vmatpush3.bf16.msra.mxu0 %v683_v50 }
 0x2b9   :  { %685 = vmatprep.subr.bf16.mxu0 %v769_v0 }
 0x2bc   :  { %687 = vmatpush3.bf16.msra.mxu0 %v686_v52 }
 0x38a   :  { %v294_v38 = vpop.f32.mrb[2].mxu0 }
 0x38b   :  { %v647_v39 = vpop.f32.mrb[3].mxu0  ;;  %v299_v40 = vsel %vm298_vm6, %v294_v38, -inf }
 0x38c   :  { %300 = vmax.xlane.f32.xlu0 %v299_v40 }
 0x3a2   :  { %310 = vrot.lane.b32.xlu0 %v217_v35, %s776_s3 }
 0x419   :  { %v301_v41 = vpop.xlane.xlu0 %300 }
 0x41a   :  { %v302_v42 = vsub.f32 %v294_v38, %v301_v41 }
 0x41c   :  { %v303_v43 = vmul.f32 1.442695, %v302_v42 }
 0x41d   :  { %v311_v44 = vpop.permute.xlu0 %310 }
 0x41e   :  { %712 = vpow2.f32 %v303_v43  ;;  %649 = vmatpush3.msra.mxu1 %v311_v44 }
 0x41f   :  { %664 = vmatprep.subr.mxu1 %v771_v1 }
 0x428   :  { %v713_v45 = vpop.eup %712 }
 0x429   :  { %v305_v46 = vsel %vm298_vm6, %v713_v45, 0.0 }
 0x42a   :  { %306 = vadd.xlane.f32.xlu1 %v305_v46 }
 0x4b7   :  { %v307_v53 = vpop.xlane.xlu1 %306 }
 0x4b8   :  { %714 = vrcp.f32 %v307_v53 }
 0x4c2   :  { %v715_v54 = vpop.eup %714 }
 0x4c3   :  { %v309_v55 = vmul.f32 %v715_v54, %v713_v45 }
 0x4c5   :  { %651 = vmatmul.mubr.msk.f32.vlgmr.msra.gmra.mrb[2].mxu1 %vm298_vm6, %v309_v55 }
 0x4c6   :  { %666 = vmatprep.mubr.msk.f32.mxu1 %vm770_vm0, %v771_v1 }
 0x598   :  { %v382_v56 = vpop.f32.mrb[2].mxu1 }
 0x599   :  { %v652_v57 = vpop.f32.mrb[3].mxu1  ;;  %662 = vmatmul.mubr.msk.f32.vlgmr.msra.gmra.mrb[4].mxu0 %vm147_vm5, %v382_v56 }
 0x66c   :  { %v463_v60 = vpop.f32.mrb[4].mxu0 }
 0x66d   :  { %v464_v61 = vadd.f32 %v463_v60, %v393_v59  ;;  %v663_v62 = vpop.f32.mrb[5].mxu0 }
 0x66f   :  { %v467_v63 = vadd.f32 %v464_v61, %v145_v34 }
 0x671   :  { %v468_v0 = vsel %vm147_vm5, %v467_v63, 0.0 }
 0x672   :  { %469 = vadd.xlane.f32.xlu1 %v468_v0 }
 0x6ff   :  { %v470_v2 = vpop.xlane.xlu1 %469 }
 0x700   :  { %v472_v3 = vmul.f32 0.03125, %v470_v2 }
 0x702   :  { %v473_v4 = vsub.f32 %v467_v63, %v472_v3 }
 0x704   :  { %v474_v5 = vmul.f32 %v473_v4, %v473_v4 }
 0x706   :  { %v475_v1 = vsel %vm147_vm5, %v474_v5, 0.0 }
 0x707   :  { %476 = vadd.xlane.f32.xlu1 %v475_v1 }
 0x718   :  { %494 = vperm.xlu1 %710, %v839_v25  }
 0x794   :  { %v477_v6 = vpop.xlane.xlu1 %476 }
 0x795   :  { %v478_v7 = vmul.f32 0.03125, %v477_v6 }
 0x797   :  { %v479_v8 = vadd.f32 1e-05, %v478_v7 }
 0x798   :  { %v495_v18 = vpop.permute.xlu1 %494 }
 0x799   :  { %716 = vrsqrt.f32 %v479_v8  ;;  %v497_v19 = vrot.slane %v495_v18, 6 }
 0x7a3   :  { %v717_v12 = vpop.eup %716 }
 0x7a4   :  { %v481_v13 = vmul.f32 %v717_v12, %v473_v4 }
 0x7a6   :  { %v486_v15 = vmul.f32 %v485_v11, %v481_v13 }
 0x7a8   :  { %v491_v16 = vadd.f32 %v490_v14, %v486_v15 }
 0x7aa   :  { %665 = vmatpush3.xpose.msk.msra.mxu1 %vm147_vm5, %v491_v16 }
 0x7ad   :  { %667 = vmatmul.mubr.msk.f32.vlgmr.msra.gmra.mrb[4].mxu1 %vm147_vm5, %v496_v17 }
 0x880   :  { %v570_v20 = vpop.f32.mrb[4].mxu1 }
 0x881   :  { %v571_v21 = vadd.f32 %v570_v20, %v497_v19  ;;  %v668_v22 = vpop.f32.mrb[5].mxu1 }
 0x883   :  { %575 = vst.msk [vmem:[#allocation5] sm:$0x1] %vm574_vm7, %v571_v21 }
 0x884   :  { %751 = shalt.err (!%p748_p12)
}
 0x885   :  { %s752_s14 = scalar_lea.hbm %s888_s4, 16 }
 0x886   :  { %p753_p13 = scmp.ne.s32.totalorder %s888_s4, %s752_s14  ;;  %p756_p0 = scmp.lt.u32.totalorder %s752_s14, %s888_s4 }
 0x888   :  { %p758_p1 = pnand %p756_p0, %p753_p13 }
 0x88a   :  { %761 = shalt.err (!%p758_p1)
}
 0x88b   :  { %585 = dma.vmem_to_hbm [thread:$0]  %s583_s9, 16, %s888_s4, [#allocation4]  }
 0x88c   :  { %764 = dma.done.wait [#allocation4], 16  }
 0x88d   :  { %765 = vsyncadd [#allocation4], 4294967280 }
 0x88e   :  { %589 = vsyncpa [#allocation3], 1 }
 0x88f   :  { %590 = vsyncpa [#allocation4], 1 }

</bundles_post_ra>
